<compile_context>
chip_gen: v7x
topology: tpu7x:2x2x1
jax: 0.10.0
libtpu: 0.0.40
codegen_flags: <defaults>
</compile_context>

<pallas_src>
import functools

import jax
import jax.numpy as jnp
from jax.experimental import pallas as pl
from jax.experimental.pallas import tpu as pltpu


# ----------------------------------------------------------------------------
# Row-tiled linear projection: out = x @ w_t + b   (w_t is (Cin, Cout))
# ----------------------------------------------------------------------------
def linear_kernel(x_ref, w_ref, b_ref, o_ref):
    o_ref[...] = (
        jnp.dot(x_ref[...], w_ref[...], preferred_element_type=jnp.float32)
        + b_ref[...]
    )


def pallas_linear(x, w_t, b, *, block_rows=512):
    """x: (R, Cin) -> (R, Cout), bf16 operands, f32 accumulation/output."""
    R, Cin = x.shape
    Cout = w_t.shape[1]
    br = min(R, block_rows)
    grid = (pl.cdiv(R, br),)
    return pl.pallas_call(
        linear_kernel,
        out_shape=jax.ShapeDtypeStruct((R, Cout), jnp.float32),
        grid=grid,
        in_specs=[
            pl.BlockSpec((br, Cin), lambda i: (i, 0)),
            pl.BlockSpec((Cin, Cout), lambda i: (0, 0)),
            pl.BlockSpec((1, Cout), lambda i: (0, 0)),
        ],
        out_specs=pl.BlockSpec((br, Cout), lambda i: (i, 0)),
        compiler_params=pltpu.CompilerParams(dimension_semantics=("parallel",)),
    )(x.astype(jnp.bfloat16), w_t.astype(jnp.bfloat16), b.astype(jnp.float32))


# ----------------------------------------------------------------------------
# RPE attention kernel.  Grid = (B, H, NK, MK), MK ("arbitrary") innermost.
# Per grid step (b, h, ni, mi):
#   q:    (Nblk, c)      bf16   (pre-scaled by 1/sqrt(c))
#   k:    (Mblk, c)      bf16
#   v:    (M, c)         bf16   (full M, resident per (b,h))
#   e:    (Nblk, Mblk, C) bf16  raw embed_qk block
#   wp:   (c, C)         bf16   per-head slice of proj_p weight
#   bp:   (1, c)         bf16   per-head slice of proj_p bias
#   fw:   (Nblk, Mblk)   f32    attention_factors * key_weights
#   bias: (1, Mblk)      f32    0 / -1e30 additive key mask
# Scratch: qp (Nblk, C) bf16, qb (Nblk, 1) f32, raw scores (MK, Nblk, Mblk) f32.
# ----------------------------------------------------------------------------
def rpe_attn_kernel(q_ref, k_ref, v_ref, e_ref, wp_ref, bp_ref, fw_ref, bias_ref,
                    o_ref, attn_ref, qp_scr, qb_scr, s_scr, *, m_blocks, block_m):
    mi = pl.program_id(3)

    # qp / qb depend only on (b, h, ni): compute once per M sweep.
    @pl.when(mi == 0)
    def _init():
        q = q_ref[...]
        qp = jnp.dot(q, wp_ref[...], preferred_element_type=jnp.float32)     # (Nblk, C)
        qp_scr[...] = qp.astype(qp_scr.dtype)
        qb_scr[...] = jnp.sum(
            q.astype(jnp.float32) * bp_ref[...].astype(jnp.float32),
            axis=1, keepdims=True)                                           # (Nblk, 1)

    q = q_ref[...]                                                            # (Nblk, c)
    k = k_ref[...]                                                            # (Mblk, c)

    # scores_e = (q / sqrt(c)) @ k^T
    s_e = jnp.dot(q, k.T, preferred_element_type=jnp.float32)                 # (Nblk, Mblk)

    # scores_p = sum_C embed[n, m, C] * qp[n, C]   (batched over n, on the MXU)
    s_p = jax.lax.dot_general(
        e_ref[...], qp_scr[...],
        dimension_numbers=(((2,), (1,)), ((0,), (0,))),
        preferred_element_type=jnp.float32)                                   # (Nblk, Mblk)

    # (e + p) * scale already folded into q; apply factors*weights and mask bias.
    s = (s_e + s_p + qb_scr[...]) * fw_ref[...] + bias_ref[...]
    s_scr[mi] = s

    # Final M-block: global softmax over all stored score blocks, write attn,
    # then hidden = attn @ V (V is fully resident per head).
    @pl.when(mi == m_blocks - 1)
    def _finalize():
        scores = s_scr[...]                                                   # (MK, Nblk, Mblk)
        m = jnp.max(jnp.max(scores, axis=2, keepdims=True), axis=0, keepdims=True)
        e = jnp.exp(scores - m)
        l = jnp.sum(jnp.sum(e, axis=2, keepdims=True), axis=0, keepdims=True)
        p = e * pl.reciprocal(l, approx=True)                                 # (MK, Nblk, Mblk)

        acc = jnp.zeros(o_ref.shape, jnp.float32)
        for j in range(m_blocks):                                             # static unroll
            pj = p[j]                                                         # (Nblk, Mblk)
            attn_ref[:, j * block_m:(j + 1) * block_m] = pj
            acc = acc + jnp.dot(pj.astype(v_ref.dtype),
                                v_ref[j * block_m:(j + 1) * block_m, :],
                                preferred_element_type=jnp.float32)
        o_ref[...] = acc


def _pick_block(dim, cap, align):
    """Largest block <= cap that divides dim and is a multiple of `align`
    (falls back to the full dim, which is always legal)."""
    if dim <= cap:
        return dim
    b = (cap // align) * align
    while b >= align:
        if dim % b == 0:
            return b
        b -= align
    return dim


def rpe_attention(q, k, v, embed, wp_heads, bp_heads, fw, bias,
                  *, block_n=128, block_m=128):
    """q: (B,H,N,c) bf16 (pre-scaled); k,v: (B,H,M,c) bf16; embed: (B,N,M,C) bf16
       wp_heads: (H,c,C) bf16; bp_heads: (H,1,c) bf16
       fw: (B,N,M) f32 (factors*weights); bias: (B,1,M) f32 (0 / -1e30 mask)
       -> hidden (B,H,N,c) f32, attn (B,H,N,M) f32"""
    B, H, N, c = q.shape
    M = k.shape[2]
    C = embed.shape[-1]

    bn = _pick_block(N, block_n, 8)     # sublane-dim tile
    bm = _pick_block(M, block_m, 128)   # lane-dim tile (must divide M exactly)
    nk = N // bn
    mk = M // bm

    kernel = functools.partial(rpe_attn_kernel, m_blocks=mk, block_m=bm)

    hidden, attn = pl.pallas_call(
        kernel,
        out_shape=(
            jax.ShapeDtypeStruct((B, H, N, c), jnp.float32),
            jax.ShapeDtypeStruct((B, H, N, M), jnp.float32),
        ),
        grid=(B, H, nk, mk),
        in_specs=[
            pl.BlockSpec((None, None, bn, c), lambda b, h, ni, mi: (b, h, ni, 0)),   # q
            pl.BlockSpec((None, None, bm, c), lambda b, h, ni, mi: (b, h, mi, 0)),   # k
            pl.BlockSpec((None, None, M, c), lambda b, h, ni, mi: (b, h, 0, 0)),     # v (resident)
            pl.BlockSpec((None, bn, bm, C), lambda b, h, ni, mi: (b, ni, mi, 0)),    # raw embed_qk
            pl.BlockSpec((None, c, C), lambda b, h, ni, mi: (h, 0, 0)),              # Wp head
            pl.BlockSpec((None, 1, c), lambda b, h, ni, mi: (h, 0, 0)),              # bp head
            pl.BlockSpec((None, bn, bm), lambda b, h, ni, mi: (b, ni, mi)),          # fac*kw
            pl.BlockSpec((None, 1, bm), lambda b, h, ni, mi: (b, 0, mi)),            # mask bias
        ],
        out_specs=(
            pl.BlockSpec((None, None, bn, c), lambda b, h, ni, mi: (b, h, ni, 0)),   # hidden
            pl.BlockSpec((None, None, bn, M), lambda b, h, ni, mi: (b, h, ni, 0)),   # attn (lane-dense)
        ),
        scratch_shapes=[
            pltpu.VMEM((bn, C), jnp.bfloat16),      # qp = q_head @ Wp_head
            pltpu.VMEM((bn, 1), jnp.float32),       # qb = q_head . bp_head
            pltpu.VMEM((mk, bn, bm), jnp.float32),  # raw scores, all M blocks
        ],
        compiler_params=pltpu.CompilerParams(
            dimension_semantics=("parallel", "parallel", "parallel", "arbitrary"),
            vmem_limit_bytes=48 * 1024 * 1024,
        ),
    )(q, k, v, embed, wp_heads, bp_heads, fw, bias)
    return hidden, attn


# ----------------------------------------------------------------------------
# Module wrapper (non-equivariant path of RPEMultiHeadAttention)
# ----------------------------------------------------------------------------
class RPEMultiHeadAttentionPallas:
    def __init__(self, d_model, num_heads, key):
        assert d_model % num_heads == 0
        self.d_model = d_model
        self.num_heads = num_heads
        self.d_per_head = d_model // num_heads

        bound = 1.0 / (d_model ** 0.5)
        keys = jax.random.split(key, 8)

        def init_linear(kw_, kb_):
            # torch.nn.Linear default init: U(-1/sqrt(fan_in), 1/sqrt(fan_in))
            w = jax.random.uniform(kw_, (d_model, d_model), jnp.float32, -bound, bound)
            b = jax.random.uniform(kb_, (1, d_model), jnp.float32, -bound, bound)
            return w, b  # w is (Cout, Cin) like torch; transposed/reshaped at call time

        self.wq, self.bq = init_linear(keys[0], keys[1])
        self.wk, self.bk = init_linear(keys[2], keys[3])
        self.wv, self.bv = init_linear(keys[4], keys[5])
        self.wp, self.bp = init_linear(keys[6], keys[7])

    def __call__(self, input_q, input_k, input_v, embed_qk,
                 key_weights=None, key_masks=None, attention_factors=None):
        B, N, C = input_q.shape
        M = input_k.shape[1]
        H, c = self.num_heads, self.d_per_head
        scale = 1.0 / (c ** 0.5)

        # --- q/k/v projections (row-tiled Pallas matmuls, bf16 x bf16 -> f32) ---
        q = pallas_linear(input_q.reshape(B * N, C), self.wq.T, self.bq)
        k = pallas_linear(input_k.reshape(B * M, C), self.wk.T, self.bk)
        v = pallas_linear(input_v.reshape(B * M, C), self.wv.T, self.bv)

        # heads (small glue copies), fold 1/sqrt(c) into q, bf16 matmul operands
        q = (q * scale).reshape(B, N, H, c).transpose(0, 2, 1, 3).astype(jnp.bfloat16)
        k = k.reshape(B, M, H, c).transpose(0, 2, 1, 3).astype(jnp.bfloat16)
        v = v.reshape(B, M, H, c).transpose(0, 2, 1, 3).astype(jnp.bfloat16)

        # proj_p is applied algebraically to q instead of to embed_qk:
        #   Wp is (Cout, Cin); head h uses rows [h*c, (h+1)*c).
        wp_heads = self.wp.reshape(H, c, C).astype(jnp.bfloat16)   # (H, c, C)
        bp_heads = self.bp.reshape(H, 1, c).astype(jnp.bfloat16)   # (H, 1, c)
        embed = embed_qk.astype(jnp.bfloat16)                      # raw (B, N, M, C)

        # optional inputs, pre-fused on the host side
        if attention_factors is None:
            fac = jnp.ones((B, N, M), jnp.float32)
        else:
            fac = attention_factors.astype(jnp.float32)
        if key_weights is None:
            kw = jnp.ones((B, 1, M), jnp.float32)
        else:
            kw = key_weights.astype(jnp.float32).reshape(B, 1, M)
        fw = fac * kw                                              # (B, N, M)
        if key_masks is None:
            bias = jnp.zeros((B, 1, M), jnp.float32)
        else:
            # additive mask; -1e30 (finite) instead of -inf to avoid NaN rows
            bias = jnp.where(key_masks.reshape(B, 1, M),
                             jnp.float32(-1e30), jnp.float32(0.0))

        hidden, attn = rpe_attention(q, k, v, embed, wp_heads, bp_heads, fw, bias)

        # 'b h n c -> b n (h c)'
        hidden = hidden.transpose(0, 2, 1, 3).reshape(B, N, C)
        return hidden, attn   # (B, N, C), (B, H, N, M)


# ----------------------------------------------------------------------------
if __name__ == "__main__":
    B, N, M = 2, 8, 8
    d_model, num_heads = 32, 4

    key = jax.random.PRNGKey(0)
    k_params, k_q, k_k, k_v, k_p, k_w, k_f = jax.random.split(key, 7)

    module = RPEMultiHeadAttentionPallas(d_model, num_heads, k_params)

    input_q = jax.random.normal(k_q, (B, N, d_model), jnp.float32)
    input_k = jax.random.normal(k_k, (B, M, d_model), jnp.float32)
    input_v = jax.random.normal(k_v, (B, M, d_model), jnp.float32)
    embed_qk = jax.random.normal(k_p, (B, N, M, d_model), jnp.float32)

    key_weights = jax.random.uniform(k_w, (B, M), jnp.float32, 0.5, 1.5)
    attention_factors = jax.random.uniform(k_f, (B, N, M), jnp.float32, 0.5, 1.5)
    # mask the last two keys of batch 1 (not all keys masked per row)
    key_masks = jnp.zeros((B, M), jnp.bool_).at[1, -2:].set(True)

    hidden, attn = module(input_q, input_k, input_v, embed_qk,
                          key_weights=key_weights,
                          key_masks=key_masks,
                          attention_factors=attention_factors)
    jax.block_until_ready((hidden, attn))

    assert hidden.shape == (B, N, d_model)
    assert attn.shape == (B, num_heads, N, M)
    assert bool(jnp.all(jnp.isfinite(hidden)))
    # softmax rows must sum to ~1 (masked columns are exactly zero)
    assert bool(jnp.allclose(attn.sum(-1), 1.0, atol=5e-2))
    print("KERNEL_OK")
</pallas_src>

<mosaic_0001>
module attributes {stable_mosaic.version = 11 : i64} {
  func.func @linear_kernel(%arg0: i32, %arg1: memref<16x32xbf16, #tpu.memory_space<vmem>>, %arg2: memref<32x32xbf16, #tpu.memory_space<vmem>>, %arg3: memref<1x32xf32, #tpu.memory_space<vmem>>, %arg4: memref<16x32xf32, #tpu.memory_space<vmem>>) attributes {dimension_semantics = [#tpu.dimension_semantics<parallel>], iteration_bounds = array<i64: 1>, scalar_prefetch = 0 : i64, scratch_operands = 0 : i64, tpu.core_type = #tpu.core_type<tc>, window_params = [{transform_indices = @transform_0, window_bounds = array<i64: 16, 32>}, {pipeline_mode = #tpu.pipeline_mode<synchronous>, transform_indices = @transform_1, window_bounds = array<i64: 32, 32>}, {pipeline_mode = #tpu.pipeline_mode<synchronous>, transform_indices = @transform_2, window_bounds = array<i64: 1, 32>}, {transform_indices = @transform_3, window_bounds = array<i64: 16, 32>}]} {
    %c0 = arith.constant 0 : index
    %c0_0 = arith.constant 0 : index
    %0 = vector.load %arg1[%c0, %c0_0] : memref<16x32xbf16, #tpu.memory_space<vmem>>, vector<16x32xbf16>
    %c0_1 = arith.constant 0 : index
    %c0_2 = arith.constant 0 : index
    %1 = vector.load %arg2[%c0_1, %c0_2] : memref<32x32xbf16, #tpu.memory_space<vmem>>, vector<32x32xbf16>
    %cst = arith.constant dense<0.000000e+00> : vector<16x32xf32>
    %2 = tpu.matmul %0, %1, %cst {dimension_numbers = #tpu.dot_dimension_numbers<[1], [0], [0], [1], [0, 0, 1, 1], [], []>} : vector<16x32xbf16>, vector<32x32xbf16>, vector<16x32xf32> -> vector<16x32xf32>
    %c0_3 = arith.constant 0 : index
    %c0_4 = arith.constant 0 : index
    %3 = vector.load %arg3[%c0_3, %c0_4] : memref<1x32xf32, #tpu.memory_space<vmem>>, vector<1x32xf32>
    %4 = vector.broadcast %3 : vector<1x32xf32> to vector<16x32xf32>
    %5 = arith.addf %2, %4 : vector<16x32xf32>
    %c0_5 = arith.constant 0 : index
    %c0_6 = arith.constant 0 : index
    %6 = vector.load %arg4[%c0_5, %c0_6] : memref<16x32xf32, #tpu.memory_space<vmem>>, vector<16x32xf32>
    tpu.vector_store %arg4[%c0_5, %c0_6], %5 {strides = array<i32>} : memref<16x32xf32, #tpu.memory_space<vmem>>, vector<16x32xf32>,
    return
  }
  func.func @transform_0(%arg0: i32) -> (i32, i32) {
    %c0_i32 = arith.constant 0 : i32
    %c0_i32_0 = arith.constant 0 : i32
    return %arg0, %c0_i32 : i32, i32
  }
  func.func @transform_1(%arg0: i32) -> (i32, i32) {
    %c0_i32 = arith.constant 0 : i32
    %c0_i32_0 = arith.constant 0 : i32
    %c0_i32_1 = arith.constant 0 : i32
    return %c0_i32, %c0_i32_0 : i32, i32
  }
  func.func @transform_2(%arg0: i32) -> (i32, i32) {
    %c0_i32 = arith.constant 0 : i32
    %c0_i32_0 = arith.constant 0 : i32
    %c0_i32_1 = arith.constant 0 : i32
    return %c0_i32, %c0_i32_0 : i32, i32
  }
  func.func @transform_3(%arg0: i32) -> (i32, i32) {
    %c0_i32 = arith.constant 0 : i32
    %c0_i32_0 = arith.constant 0 : i32
    return %arg0, %c0_i32 : i32, i32
  }
}

</mosaic_0001>

<bundles_post_ra>
// kernel: tpu_custom_call.1
= control target key start
LH: loop header
LB: loop body
LE: loop exit
PB: predicated region body
PF: predicated region fallthrough
CT: control target
= control target key end

     0   :  { %8 = vsyncpa [#allocation3], 0  ;;  %s307_s0 = inlined_call_operand.hbm [shape: bf16[16,32], index: 0, kind: input, shape index: {}]   ;;  %s308_s1 = inlined_call_operand.hbm [shape: bf16[32,32], index: 1, kind: input, shape index: {}]   ;;  %s309_s2 = inlined_call_operand.vmem [shape: f32[1,32], index: 2, kind: input, shape index: {}]   ;;  %s310_s3 = inlined_call_operand.hbm [shape: f32[16,32], index: 3, kind: output, shape index: {}]  }
   0x1   :  { %9 = vsyncpa [#allocation6], 0 }
   0x2   :  { %10 = vsyncpa [#allocation4], 0  ;;  %s239_s12 = smov [#allocation2]   ;;  %s167_s16 = scalar_lea.hbm %s307_s0, 128 }
   0x3   :  { %s16_s13 = sshll.u32 %s239_s12, 4  ;;  %p168_p0 = scmp.ne.s32.totalorder %s307_s0, %s167_s16  ;;  %s17_s13 = int_to_ptr.vmem [resolvable:$true] %s16_s13 }
   0x4   :  { %p171_p1 = scmp.lt.u32.totalorder %s167_s16, %s307_s0 }
   0x6   :  { %p173_p2 = pnand %p171_p1, %p168_p0 }
   0x8   :  { %176 = shalt.err (!%p173_p2)
}
   0x9   :  { %s177_s21 = scalar_lea.vmem %s17_s13, 128  ;;  %p182_p4 = scmp.lt.s32.totalorder %s17_s13, %s17_s13 }
   0xa   :  { %p178_p3 = scmp.ne.s32.totalorder %s17_s13, %s177_s21  ;;  %p183_p5 = scmp.lt.s32.totalorder %s177_s21, %s177_s21 }
   0xc   :  { %p184_p6 = por %p183_p5, %p182_p4 }
   0xe   :  { %p185_p7 = pnand %p184_p6, %p178_p3 }
  0x10   :  { %188 = shalt.err (!%p185_p7)
}
  0x11   :  { %s240_s22 = smov 64   ;;  %s241_s23 = smov 4  }
  0x12   :  { %22 = dma.hbm_to_vmem [thread:$0]  %s307_s0, 128, %s17_s13, [#allocation3], %s240_s22, %s240_s22, %s241_s23  }
  0x13   :  { %s242_s26 = smov [#allocation5]   ;;  %s189_s30 = scalar_lea.hbm %s308_s1, 256 }
  0x14   :  { %s28_s27 = sshll.u32 %s242_s26, 4  ;;  %p190_p8 = scmp.ne.s32.totalorder %s308_s1, %s189_s30  ;;  %s29_s27 = int_to_ptr.vmem [resolvable:$true] %s28_s27 }
  0x15   :  { %p193_p9 = scmp.lt.u32.totalorder %s189_s30, %s308_s1 }
  0x17   :  { %p195_p10 = pnand %p193_p9, %p190_p8 }
  0x19   :  { %198 = shalt.err (!%p195_p10)
}
  0x1a   :  { %s199_s8 = scalar_lea.vmem %s29_s27, 256  ;;  %p204_p12 = scmp.lt.s32.totalorder %s29_s27, %s29_s27 }
  0x1b   :  { %p200_p11 = scmp.ne.s32.totalorder %s29_s27, %s199_s8  ;;  %p205_p13 = scmp.lt.s32.totalorder %s199_s8, %s199_s8 }
  0x1d   :  { %p206_p0 = por %p205_p13, %p204_p12 }
  0x1f   :  { %p207_p1 = pnand %p206_p0, %p200_p11 }
  0x21   :  { %210 = shalt.err (!%p207_p1)
}
  0x22   :  { %34 = dma.hbm_to_vmem [thread:$0]  %s308_s1, 256, %s29_s27, [#allocation6], %s240_s22, %s240_s22, %s241_s23  }
  0x23   :  { %233 = dma.done.wait [#allocation3], 128  }
  0x24   :  { %234 = vsyncadd [#allocation3], 4294967168 }
  0x25   :  { %235 = dma.done.wait [#allocation6], 256  }
  0x26   :  { %236 = vsyncadd [#allocation6], 4294967040  ;;  %v243_v0 = vmov 0.0   ;;  %vm244_vm0 = vmmov 0   ;;  %v164_v1 = vld [vmem:[#allocation5] sm:$0xff]   ;;  %v165_v2 = vld [vmem:[#allocation5 + $0x8] sm:$0xff]  }
  0x27   :  { %147 = vmatprep.subr.bf16.mxu0 %v243_v0  ;;  %151 = vmatprep.mubr.msk.bf16.mxu0 %vm244_vm0, %v243_v0  ;;  %v166_v3 = vld [vmem:[#allocation2] sm:$0xff]   ;;  %vm74_vm1 = vcmask 261120   ;;  %s245_s1 = smov [#allocation7]  }
  0x28   :  { %148 = vmatpush3.bf16.msra.mxu0 %v164_v1  ;;  %v139_v4 = vld [vmem:[%s309_s2] ss:$0 sm:$0xff]  ;;  %s126_s12 = sshll.u32 %s245_s1, 4  ;;  %s127_s12 = int_to_ptr.vmem [resolvable:$true] %s126_s12 }
  0x29   :  { %149 = vmatprep.subr.bf16.mxu0 %v243_v0  ;;  %s211_s13 = scalar_lea.vmem %s127_s12, 256  ;;  %p216_p3 = scmp.lt.s32.totalorder %s127_s12, %s127_s12 }
  0x2a   :  { %p212_p2 = scmp.ne.s32.totalorder %s127_s12, %s211_s13  ;;  %p217_p4 = scmp.lt.s32.totalorder %s211_s13, %s211_s13 }
  0x2c   :  { %150 = vmatpush3.bf16.msra.mxu0 %v165_v2  ;;  %p218_p5 = por %p217_p4, %p216_p3 }
  0x2e   :  { %p219_p6 = pnand %p218_p5, %p212_p2 }
  0x2f   :  { %152 = vmatmul.mubr.msk.bf16.vlgmr.msra.gmra.mrb[0].mxu0 %vm74_vm1, %v166_v3 }
 0x102   :  { %v112_v5 = vpop.f32.mrb[0].mxu0 }
 0x103   :  { %v113_v6 = vadd.f32 %v139_v4, %v112_v5  ;;  %v153_v7 = vpop.f32.mrb[1].mxu0 }
 0x104   :  { %v115_v8 = vpop.f32.mrb[2].mxu0 }
 0x105   :  { %119 = vst.msk [vmem:[#allocation7] sm:$0xff] %vm74_vm1, %v113_v6  ;;  %v116_v9 = vadd.f32 %v139_v4, %v115_v8  ;;  %v154_v10 = vpop.f32.mrb[3].mxu0 }
 0x107   :  { %120 = vst.msk [vmem:[#allocation7 + $0x8] sm:$0xff] %vm74_vm1, %v116_v9 }
 0x108   :  { %222 = shalt.err (!%p219_p6)
}
 0x109   :  { %s223_s15 = scalar_lea.hbm %s310_s3, 256 }
 0x10a   :  { %p224_p7 = scmp.ne.s32.totalorder %s310_s3, %s223_s15  ;;  %p227_p8 = scmp.lt.u32.totalorder %s223_s15, %s310_s3 }
 0x10c   :  { %p229_p9 = pnand %p227_p8, %p224_p7 }
 0x10e   :  { %232 = shalt.err (!%p229_p9)
}
 0x10f   :  { %s246_s20 = smov 128   ;;  %s247_s21 = smov 8  }
 0x110   :  { %132 = dma.vmem_to_hbm [thread:$0]  %s127_s12, 256, %s310_s3, [#allocation4], %s246_s20, %s246_s20, %s247_s21  }
 0x111   :  { %237 = dma.done.wait [#allocation4], 256  }
 0x112   :  { %238 = vsyncadd [#allocation4], 4294967040 }
 0x113   :  { %136 = vsyncpa [#allocation3], 1 }
 0x114   :  { %137 = vsyncpa [#allocation6], 1 }
 0x115   :  { %138 = vsyncpa [#allocation4], 1 }

</bundles_post_ra>
